<compile_context>
chip_gen: v5e
topology: v5e:2x2
jax: 0.10.0
libtpu: 0.0.40
codegen_flags: <defaults>
</compile_context>

<pallas_src>
import functools

import jax
import jax.numpy as jnp
from jax import lax
from jax.experimental import pallas as pl
from jax.experimental.pallas import tpu as pltpu


def _ce2d_kernel(x_ref, t_ref, loss_ref, counts_ref, *,
                 hw, tw, acc_w, tiles_per_split, needs_mask):
    """One (1, C, TW) logits tile: class on sublanes, pixels on lanes."""
    j = pl.program_id(2)

    @pl.when(j == 0)
    def _():
        loss_ref[...] = jnp.zeros_like(loss_ref)
        counts_ref[...] = jnp.zeros_like(counts_ref)

    logits = x_ref[0].astype(jnp.float32)            # (C, TW) f32 for exp/log path
    tgt = t_ref[0]                                   # (1, TW) int32
    c = logits.shape[0]

    cls = lax.broadcasted_iota(jnp.int32, (c, tw), 0)
    oh = cls == tgt                                  # (C, TW) bool one-hot mask

    if needs_mask:
        # Ragged lane tail (and clamped duplicate tiles from the pixel split):
        # kill both the loss contribution and the counts via the mask only.
        # No logits sanitize needed — jnp.where is a select, so NaN/inf in the
        # out-of-bounds padding cannot leak into the accumulated value.
        tile_idx = pl.program_id(1) * tiles_per_split + j
        px = tile_idx * tw + lax.broadcasted_iota(jnp.int32, (1, tw), 1)
        oh = jnp.logical_and(oh, px < hw)

    # numerically-stable log-sum-exp over the class (sublane) axis
    m = jnp.max(logits, axis=0, keepdims=True)                                # (1, TW)
    lse = jnp.log(jnp.sum(jnp.exp(logits - m), axis=0, keepdims=True)) + m    # (1, TW)

    # per-class unweighted CE terms; weight applied in the XLA epilogue
    contrib = jnp.where(oh, lse - logits, 0.0)       # (C, TW)
    cnt = oh.astype(jnp.int32)                       # (C, TW)

    # lane-dense fold TW -> acc_w: static lane-aligned slices, pure VPU adds
    nblk = tw // acc_w
    l_acc = contrib[:, :acc_w]
    c_acc = cnt[:, :acc_w]
    for k in range(1, nblk):
        sl = slice(k * acc_w, (k + 1) * acc_w)
        l_acc = l_acc + contrib[:, sl]
        c_acc = c_acc + cnt[:, sl]

    # accumulate into the resident output blocks (constant block index along j)
    loss_ref[...] += l_acc[None, None]               # (1, 1, C, acc_w)
    counts_ref[...] += c_acc[None, None]             # (1, 1, C, acc_w)


def _pick_tile_w(hw, c, itemsize, tile_w):
    if tile_w is not None:
        return int(tile_w)
    if hw <= 4096:
        return hw                                    # single full-dim tile
    # Working-set target ~26 MiB: 2x double-buffered (logits + target) slabs
    # plus ~6 full-tile f32 temporaries (f32 cast, iota, mask, exp, select, fold).
    # Fits the default scoped VMEM on v6e/v7x and stays well under v7x's
    # 64 MiB/TC physical ceiling; vmem_limit_bytes is raised explicitly below.
    budget = 26 * 1024 * 1024
    per_px = 2 * (c * itemsize + 4) + 6 * c * 4
    tw = min(budget // per_px, 128 * 1024)           # cap keeps a few grid steps pipelined
    tw = max(1024, (tw // 1024) * 1024)              # multiple of 1024 -> clean lane fold
    if hw % 1024 == 0:
        tw = min(tw, hw)
    return tw


def _pick_acc_w(tw):
    if tw % 1024 == 0:
        return 1024
    if tw % 128 == 0:
        return 128
    return tw                                        # small / full-dim blocks


@functools.partial(jax.jit, static_argnames=("tile_w", "pixel_split"))
def cross_entropy_loss_2d_val(logits_nchw, target_nhw, weight,
                              tile_w=None, pixel_split=None):
    """logits_nchw: (N, C, H, W) float; target_nhw: (N, H, W) int; weight: (C,) float."""
    n, c, h, w_sp = logits_nchw.shape
    hw = h * w_sp

    # free views, no transpose / no pad: class on sublanes, pixels on lanes
    x = logits_nchw.reshape(n, c, hw)
    t = target_nhw.reshape(n, 1, hw)
    if t.dtype != jnp.int32:
        # TODO(synk): sub-32-bit targets could be DMA'd natively and widened
        # in-kernel to save this one-time HBM pass.
        t = t.astype(jnp.int32)
    w = jnp.asarray(weight, jnp.float32)

    tw = _pick_tile_w(hw, c, logits_nchw.dtype.itemsize, tile_w)
    acc_w = _pick_acc_w(tw)
    num_tiles = pl.cdiv(hw, tw)

    # 2-way pixel-axis split keeps v7x's second TensorCore busy at N == 1;
    # harmless (serial) on single-core v5e/v6e.
    if pixel_split is None:
        pixel_split = 2 if (n == 1 and num_tiles >= 2) else 1
    split = int(pixel_split)
    tiles_per_split = pl.cdiv(num_tiles, split)

    exact_cover = (split * tiles_per_split == num_tiles)
    needs_mask = (hw % tw != 0) or (not exact_cover)

    last = num_tiles - 1
    if exact_cover:
        def in_idx(b, p, j):
            return (b, 0, p * tiles_per_split + j)
    else:
        # clamp the block index for the (fully masked) overhang tile
        def in_idx(b, p, j):
            return (b, 0, jnp.minimum(p * tiles_per_split + j, last))

    kernel = functools.partial(_ce2d_kernel, hw=hw, tw=tw, acc_w=acc_w,
                               tiles_per_split=tiles_per_split,
                               needs_mask=needs_mask)

    # TODO(synk): if the v7x 64 MiB ceiling ever forces a tiny slab (huge C,
    # bf16), request pipeline_mode=pl.Buffered(3) on the logits BlockSpec.
    loss_parts, count_parts = pl.pallas_call(
        kernel,
        out_shape=(
            jax.ShapeDtypeStruct((n, split, c, acc_w), jnp.float32),  # per-class loss partials
            jax.ShapeDtypeStruct((n, split, c, acc_w), jnp.int32),    # per-class pixel counts
        ),
        grid_spec=pltpu.PrefetchScalarGridSpec(
            num_scalar_prefetch=0,
            grid=(n, split, tiles_per_split),
            in_specs=[
                pl.BlockSpec((1, c, tw), in_idx),
                pl.BlockSpec((1, 1, tw), in_idx),
            ],
            out_specs=(
                pl.BlockSpec((1, 1, c, acc_w), lambda b, p, j: (b, p, 0, 0)),
                pl.BlockSpec((1, 1, c, acc_w), lambda b, p, j: (b, p, 0, 0)),
            ),
        ),
        compiler_params=pltpu.CompilerParams(
            dimension_semantics=("parallel", "parallel", "arbitrary"),
            vmem_limit_bytes=48 * 1024 * 1024),
    )(x, t)

    # tiny epilogue in XLA: combine partials, apply weight, divisor, final divide
    s_c = jnp.sum(loss_parts, axis=(0, 1, 3))                 # (C,) unweighted CE sums
    counts = jnp.sum(count_parts, axis=(0, 1, 3))             # (C,) int32 (torch: int64)
    divisor = jnp.maximum(jnp.sum(counts.astype(jnp.float32) * w), 1e-5)
    loss = jnp.sum(s_c * w) / divisor
    return loss, counts, divisor


def _reference(logits_nchw, target_nhw, weight):
    # plain-JAX reference for a sanity check
    logp = jax.nn.log_softmax(logits_nchw.astype(jnp.float32), axis=1)
    n, c, h, w_sp = logits_nchw.shape
    tgt = target_nhw.astype(jnp.int32)
    onehot = jax.nn.one_hot(tgt, c, axis=1)                   # (N, C, H, W)
    w = jnp.asarray(weight, jnp.float32)
    loss_px = -(onehot * logp).sum(axis=1) * w[tgt]           # (N, H, W)
    counts = jnp.bincount(tgt.flatten(), length=c)
    divisor = jnp.maximum(jnp.sum(counts * w), 1e-5)
    return loss_px.sum() / divisor, counts, divisor


if __name__ == "__main__":
    key = jax.random.PRNGKey(0)
    k1, k2, k3, k4 = jax.random.split(key, 4)

    # --- test 1: canonical small shape, auto tile (single tile, lane fold) ---
    N, C, H, W = 2, 4, 16, 16
    weight = jnp.array([1.0, 2.0, 0.5, 1.5], jnp.float32)
    logits = jax.random.normal(k1, (N, C, H, W), jnp.float32)
    target = jax.random.randint(k2, (N, H, W), 0, C, jnp.int32)

    loss, counts, divisor = cross_entropy_loss_2d_val(logits, target, weight)
    jax.block_until_ready((loss, counts, divisor))

    r_loss, r_counts, r_div = _reference(logits, target, weight)
    assert jnp.allclose(loss, r_loss, rtol=1e-4, atol=1e-5), (loss, r_loss)
    assert jnp.array_equal(counts, r_counts), (counts, r_counts)
    assert jnp.allclose(divisor, r_div, rtol=1e-5), (divisor, r_div)

    # --- test 2: ragged lane tail (hw=576 with tile 256) + odd class count ---
    N2, C2, H2, W2 = 2, 5, 24, 24
    weight2 = jnp.array([0.7, 1.3, 2.0, 0.5, 1.0], jnp.float32)
    logits2 = jax.random.normal(k3, (N2, C2, H2, W2), jnp.float32)
    target2 = jax.random.randint(k4, (N2, H2, W2), 0, C2, jnp.int32)

    loss2, counts2, div2 = cross_entropy_loss_2d_val(
        logits2, target2, weight2, tile_w=256)
    jax.block_until_ready((loss2, counts2, div2))

    r_loss2, r_counts2, r_div2 = _reference(logits2, target2, weight2)
    assert jnp.allclose(loss2, r_loss2, rtol=1e-4, atol=1e-5), (loss2, r_loss2)
    assert jnp.array_equal(counts2, r_counts2), (counts2, r_counts2)
    assert jnp.allclose(div2, r_div2, rtol=1e-5), (div2, r_div2)

    # --- test 3: N=1 with 2-way pixel split, odd tile count (clamped OOB tile) ---
    loss3, counts3, div3 = cross_entropy_loss_2d_val(
        logits2[:1], target2[:1], weight2, tile_w=256, pixel_split=2)
    jax.block_until_ready((loss3, counts3, div3))

    r_loss3, r_counts3, r_div3 = _reference(logits2[:1], target2[:1], weight2)
    assert jnp.allclose(loss3, r_loss3, rtol=1e-4, atol=1e-5), (loss3, r_loss3)
    assert jnp.array_equal(counts3, r_counts3), (counts3, r_counts3)
    assert jnp.allclose(div3, r_div3, rtol=1e-5), (div3, r_div3)

    print("KERNEL_OK")
</pallas_src>

<mosaic_0001>
module attributes {stable_mosaic.version = 11 : i64} {
  func.func @_ce2d_kernel(%arg0: i32, %arg1: i32, %arg2: i32, %arg3: memref<1x4x256xf32, #tpu.memory_space<vmem>>, %arg4: memref<1x1x256xi32, #tpu.memory_space<vmem>>, %arg5: memref<1x1x4x128xf32, #tpu.memory_space<vmem>>, %arg6: memref<1x1x4x128xi32, #tpu.memory_space<vmem>>) attributes {dimension_semantics = [#tpu.dimension_semantics<parallel>, #tpu.dimension_semantics<parallel>, #tpu.dimension_semantics<arbitrary>], iteration_bounds = array<i64: 2, 1, 1>, scalar_prefetch = 0 : i64, scratch_operands = 0 : i64, tpu.core_type = #tpu.core_type<tc>, window_params = [{transform_indices = @transform_0, window_bounds = array<i64: 1, 4, 256>}, {transform_indices = @transform_1, window_bounds = array<i64: 1, 1, 256>}, {transform_indices = @transform_2, window_bounds = array<i64: 1, 1, 4, 128>}, {transform_indices = @transform_3, window_bounds = array<i64: 1, 1, 4, 128>}]} {
    %c0_i32 = arith.constant 0 : i32
    %0 = arith.cmpi eq, %arg2, %c0_i32 : i32
    %1 = arith.extui %0 : i1 to i32
    %c0_i32_0 = arith.constant 0 : i32
    %2 = arith.cmpi ne, %1, %c0_i32_0 : i32
    scf.if %2 {
      %cst_24 = arith.constant 0.000000e+00 : f32
      %38 = vector.broadcast %cst_24 : f32 to vector<1x1x4x128xf32>
      %c0_25 = arith.constant 0 : index
      %c0_26 = arith.constant 0 : index
      %c0_27 = arith.constant 0 : index
      %c0_28 = arith.constant 0 : index
      %39 = vector.load %arg5[%c0_25, %c0_26, %c0_27, %c0_28] : memref<1x1x4x128xf32, #tpu.memory_space<vmem>>, vector<1x1x4x128xf32>
      tpu.vector_store %arg5[%c0_25, %c0_26, %c0_27, %c0_28], %38 {strides = array<i32>} : memref<1x1x4x128xf32, #tpu.memory_space<vmem>>, vector<1x1x4x128xf32>,
      %c0_i32_29 = arith.constant 0 : i32
      %40 = vector.broadcast %c0_i32_29 : i32 to vector<1x1x4x128xi32>
      %c0_30 = arith.constant 0 : index
      %c0_31 = arith.constant 0 : index
      %c0_32 = arith.constant 0 : index
      %c0_33 = arith.constant 0 : index
      %41 = vector.load %arg6[%c0_30, %c0_31, %c0_32, %c0_33] : memref<1x1x4x128xi32, #tpu.memory_space<vmem>>, vector<1x1x4x128xi32>
      tpu.vector_store %arg6[%c0_30, %c0_31, %c0_32, %c0_33], %40 {strides = array<i32>} : memref<1x1x4x128xi32, #tpu.memory_space<vmem>>, vector<1x1x4x128xi32>,
    } else {
    }
    %c0 = arith.constant 0 : index
    %c0_1 = arith.constant 0 : index
    %c0_2 = arith.constant 0 : index
    %3 = vector.load %arg3[%c0, %c0_1, %c0_2] : memref<1x4x256xf32, #tpu.memory_space<vmem>>, vector<1x4x256xf32>
    %4 = vector.shape_cast %3 : vector<1x4x256xf32> to vector<4x256xf32>
    %c0_3 = arith.constant 0 : index
    %c0_4 = arith.constant 0 : index
    %c0_5 = arith.constant 0 : index
    %5 = vector.load %arg4[%c0_3, %c0_4, %c0_5] : memref<1x1x256xi32, #tpu.memory_space<vmem>>, vector<1x1x256xi32>
    %6 = vector.shape_cast %5 : vector<1x1x256xi32> to vector<1x256xi32>
    %7 = tpu.iota {dimensions = array<i32: 0>} : vector<4x256xi32>
    %8 = vector.broadcast %6 : vector<1x256xi32> to vector<4x256xi32>
    %9 = arith.cmpi eq, %7, %8 : vector<4x256xi32>
    %cst = arith.constant dense<0xFF800000> : vector<256xf32>
    %10 = vector.multi_reduction <maximumf>, %4, %cst [0] : vector<4x256xf32> to vector<256xf32>
    %11 = vector.shape_cast %10 : vector<256xf32> to vector<1x256xf32>
    %12 = vector.broadcast %11 : vector<1x256xf32> to vector<4x256xf32>
    %13 = arith.subf %4, %12 : vector<4x256xf32>
    %14 = math.exp %13 : vector<4x256xf32>
    %cst_6 = arith.constant dense<0.000000e+00> : vector<256xf32>
    %15 = vector.multi_reduction <add>, %14, %cst_6 [0] : vector<4x256xf32> to vector<256xf32>
    %16 = vector.shape_cast %15 : vector<256xf32> to vector<1x256xf32>
    %17 = math.log %16 : vector<1x256xf32>
    %18 = arith.addf %17, %11 : vector<1x256xf32>
    %19 = vector.broadcast %18 : vector<1x256xf32> to vector<4x256xf32>
    %20 = arith.subf %19, %4 : vector<4x256xf32>
    %cst_7 = arith.constant 0.000000e+00 : f32
    %21 = vector.broadcast %cst_7 : f32 to vector<4x256xf32>
    %22 = arith.select %9, %20, %21 : vector<4x256xi1>, vector<4x256xf32>
    %23 = arith.extui %9 : vector<4x256xi1> to vector<4x256xi32>
    %24 = vector.extract_strided_slice %22 {offsets = [0, 0], sizes = [4, 128], strides = [1, 1]} : vector<4x256xf32> to vector<4x128xf32>
    %25 = vector.extract_strided_slice %23 {offsets = [0, 0], sizes = [4, 128], strides = [1, 1]} : vector<4x256xi32> to vector<4x128xi32>
    %26 = vector.extract_strided_slice %22 {offsets = [0, 128], sizes = [4, 128], strides = [1, 1]} : vector<4x256xf32> to vector<4x128xf32>
    %27 = arith.addf %24, %26 : vector<4x128xf32>
    %28 = vector.extract_strided_slice %23 {offsets = [0, 128], sizes = [4, 128], strides = [1, 1]} : vector<4x256xi32> to vector<4x128xi32>
    %29 = arith.addi %25, %28 : vector<4x128xi32>
    %c0_8 = arith.constant 0 : index
    %c0_9 = arith.constant 0 : index
    %c0_10 = arith.constant 0 : index
    %c0_11 = arith.constant 0 : index
    %30 = vector.load %arg5[%c0_8, %c0_9, %c0_10, %c0_11] : memref<1x1x4x128xf32, #tpu.memory_space<vmem>>, vector<1x1x4x128xf32>
    %31 = vector.shape_cast %27 : vector<4x128xf32> to vector<1x1x4x128xf32>
    %32 = arith.addf %30, %31 : vector<1x1x4x128xf32>
    %c0_12 = arith.constant 0 : index
    %c0_13 = arith.constant 0 : index
    %c0_14 = arith.constant 0 : index
    %c0_15 = arith.constant 0 : index
    %33 = vector.load %arg5[%c0_12, %c0_13, %c0_14, %c0_15] : memref<1x1x4x128xf32, #tpu.memory_space<vmem>>, vector<1x1x4x128xf32>
    tpu.vector_store %arg5[%c0_12, %c0_13, %c0_14, %c0_15], %32 {strides = array<i32>} : memref<1x1x4x128xf32, #tpu.memory_space<vmem>>, vector<1x1x4x128xf32>,
    %c0_16 = arith.constant 0 : index
    %c0_17 = arith.constant 0 : index
    %c0_18 = arith.constant 0 : index
    %c0_19 = arith.constant 0 : index
    %34 = vector.load %arg6[%c0_16, %c0_17, %c0_18, %c0_19] : memref<1x1x4x128xi32, #tpu.memory_space<vmem>>, vector<1x1x4x128xi32>
    %35 = vector.shape_cast %29 : vector<4x128xi32> to vector<1x1x4x128xi32>
    %36 = arith.addi %34, %35 : vector<1x1x4x128xi32>
    %c0_20 = arith.constant 0 : index
    %c0_21 = arith.constant 0 : index
    %c0_22 = arith.constant 0 : index
    %c0_23 = arith.constant 0 : index
    %37 = vector.load %arg6[%c0_20, %c0_21, %c0_22, %c0_23] : memref<1x1x4x128xi32, #tpu.memory_space<vmem>>, vector<1x1x4x128xi32>
    tpu.vector_store %arg6[%c0_20, %c0_21, %c0_22, %c0_23], %36 {strides = array<i32>} : memref<1x1x4x128xi32, #tpu.memory_space<vmem>>, vector<1x1x4x128xi32>,
    return
  }
  func.func @transform_0(%arg0: i32, %arg1: i32, %arg2: i32) -> (i32, i32, i32) {
    %c1_i32 = arith.constant 1 : i32
    %0 = arith.muli %arg1, %c1_i32 : i32
    %1 = arith.addi %0, %arg2 : i32
    %c0_i32 = arith.constant 0 : i32
    %c0_i32_0 = arith.constant 0 : i32
    return %arg0, %c0_i32, %1 : i32, i32, i32
  }
  func.func @transform_1(%arg0: i32, %arg1: i32, %arg2: i32) -> (i32, i32, i32) {
    %c1_i32 = arith.constant 1 : i32
    %0 = arith.muli %arg1, %c1_i32 : i32
    %1 = arith.addi %0, %arg2 : i32
    %c0_i32 = arith.constant 0 : i32
    %c0_i32_0 = arith.constant 0 : i32
    return %arg0, %c0_i32, %1 : i32, i32, i32
  }
  func.func @transform_2(%arg0: i32, %arg1: i32, %arg2: i32) -> (i32, i32, i32, i32) {
    %c0_i32 = arith.constant 0 : i32
    %c0_i32_0 = arith.constant 0 : i32
    %c0_i32_1 = arith.constant 0 : i32
    return %arg0, %arg1, %c0_i32, %c0_i32_0 : i32, i32, i32, i32
  }
  func.func @transform_3(%arg0: i32, %arg1: i32, %arg2: i32) -> (i32, i32, i32, i32) {
    %c0_i32 = arith.constant 0 : i32
    %c0_i32_0 = arith.constant 0 : i32
    %c0_i32_1 = arith.constant 0 : i32
    return %arg0, %arg1, %c0_i32, %c0_i32_0 : i32, i32, i32, i32
  }
}

</mosaic_0001>

<bundles_post_ra>
// kernel: cross_entropy_loss_2d_val.1
= control target key start
LH: loop header
LB: loop body
LE: loop exit
PB: predicated region body
PF: predicated region fallthrough
CT: control target
= control target key end

     0   :  { %s593_s12 = smov 0   ;;  %s595_s13 = smov 0   ;;  %s668_s0 = inlined_call_operand.vmem [shape: f32[2,4,256], index: 0, kind: input, shape index: {}]   ;;  %s669_s1 = inlined_call_operand.vmem [shape: s32[2,1,256], index: 1, kind: input, shape index: {}]   ;;  %s670_s2 = inlined_call_operand.vmem [shape: f32[2,1,4,128], index: 2, kind: output, shape index: {0}]   ;;  %s671_s3 = inlined_call_operand.vmem [shape: s32[2,1,4,128], index: 3, kind: output, shape index: {1}]  }
   0x1   :  { %s597_s14 = smov 0  }
   0x2 LB: > { %s33_s15 = sadd.s32 1, %s565_s13  ;;  %p506_p0 = scmp.ge.s32.totalorder %s569_s14, 1  ;;  %s569_s14 = sphi %s597_s14, %s14_s14   ;;  %s565_s13 = sphi %s595_s13, %s677_s13   ;;  %s561_s12 = sphi %s593_s12, %s676_s12  }
   0x3   : > { %p35_p1 = scmp.ge.s32.totalorder %s33_s15, 2  ;;  %p194_p2 = scmp.lt.s32.totalorder %s569_s14, 3 }
   0x5   : > { %s679_s15 = smov (%p35_p1, %s33_s15), 0  ;;  %p195_p3 = pnand %p506_p0, %p194_p2 }
   0x6   : > { %p243_p4 = scmp.lt.s32.totalorder (!%p195_p3), %s561_s12, 1 }
   0x7   : > { %198 = sbr.rel (%p195_p3) target bundleno = 92 (0x5c), region = 28 }
   0xc   : > { %s681_s12 = smov (!%p243_p4, %s561_s12), 1  ;;  %vm298_vm0 = vcmask 1043456   ;;  %v571_v18 = vmov 0.0   ;;  %v572_v19 = vmov 0   ;;  %v286_v23 = vlaneseq }
   0xd   : > { %s514_s16 = sshll.u32 %s681_s12, 3  ;;  %s510_s20 = sshll.u32 %s681_s12, 2 }
   0xe   : > { %s250_s19 = scalar_lea.vmem %s668_s0, %s514_s16  ;;  %s623_s23 = scalar_lea.vmem %s670_s2, %s510_s20  ;;  %v287_v25 = vshrl.u32 %v286_v23, 7 }
   0xf   : > { %v284_v0 = vld [vmem:[%s250_s19] sm:$0xff]  ;;  %s628_s26 = scalar_lea.vmem %s671_s3, %s510_s20  ;;  %282 = vst [vmem:[%s623_s23] sm:$0xf] %v571_v18  ;;  %s509_s27 = sshll.u32 %s681_s12, 1 }
  0x10   : > { %293 = vst [vmem:[#allocation1] ss:$2 sm:$0xff] %v284_v0  ;;  %s261_s30 = scalar_lea.vmem %s669_s1, %s509_s27 }
  0x11   : > { %283 = vst [vmem:[%s628_s26] sm:$0xf] %v572_v19  ;;  %v285_v24 = vld [vmem:[%s261_s30] sm:$0x3] }
  0x12   : > { %v288_v26 = vperm.slane %v285_v24, 0  ;;  %v289_v27 = vperm.slane %v285_v24, 1 }
  0x14   : > { %vm637_vm1 = vcmp.eq.s32.totalorder %v287_v25, %v288_v26  ;;  %vm641_vm2 = vcmp.eq.s32.totalorder %v287_v25, %v289_v27 }
  0x15   : > { %v356_v31 = vsel %vm637_vm1, 1, %v572_v19  ;;  %v357_v32 = vsel %vm641_vm2, 1, %v572_v19 }
  0x16   : > { %v359_v33 = vadd.s32 %v357_v32, %v356_v31 }
  0x17   : > { %v294_v1 = vld.sshfl [vmem:[#allocation1] sm:$0xff pattern:$0x75316420]  ;;  %v295_v2 = vld.sshfl [vmem:[#allocation1 + $0x8] sm:$0xff pattern:$0x75316420] }
  0x18   : > { %v299_v3 = vsel %vm298_vm0, %v294_v1, -inf  ;;  %v306_v4 = vsel %vm298_vm0, %v295_v2, -inf  ;;  %v363_v34 = vld [vmem:[%s628_s26] sm:$0xf] }
  0x19   : > { %v300_v5 = vrot.slane %v299_v3, 4  ;;  %v307_v6 = vrot.slane %v306_v4, 4  ;;  %v364_v35 = vadd.s32 %v363_v34, %v359_v33 }
  0x1b   : > { %v301_v7 = vmax.f32 %v299_v3, %v300_v5  ;;  %v308_v8 = vmax.f32 %v306_v4, %v307_v6  ;;  %365 = vst [vmem:[%s628_s26] sm:$0xf] %v364_v35 }
  0x1d   : > { %v302_v9 = vrot.slane %v301_v7, 2  ;;  %v309_v10 = vrot.slane %v308_v8, 2 }
  0x1f   : > { %v303_v11 = vmax.f32 %v301_v7, %v302_v9  ;;  %v310_v12 = vmax.f32 %v308_v8, %v309_v10 }
  0x21   : > { %v304_v13 = vrot.slane %v303_v11, 1  ;;  %v311_v14 = vrot.slane %v310_v12, 1 }
  0x23   : > { %v312_v15 = vmax.f32 %v310_v12, %v311_v14  ;;  %v305_v16 = vmax.f32 %v303_v11, %v304_v13 }
  0x25   : > { %v315_v17 = vrot.slane %v312_v15, 4 }
  0x27   : > { %v316_v20 = vsel %vm298_vm0, %v305_v16, %v315_v17 }
  0x28   : > { %v318_v21 = vsub.f32 %v284_v0, %v316_v20 }
  0x2a   : > { %v319_v22 = vmul.f32 1.442695, %v318_v21 }
  0x2c   : > { %541 = vpow2.f32 %v319_v22 }
  0x32   : > { %v542_v28 = vpop.eup %541 }
  0x33   : > { %322 = vst [vmem:[#allocation1] ss:$2 sm:$0xff] %v542_v28 }
  0x3a   : > { %v323_v36 = vld.sshfl [vmem:[#allocation1] sm:$0xff pattern:$0x75316420]  ;;  %v324_v37 = vld.sshfl [vmem:[#allocation1 + $0x8] sm:$0xff pattern:$0x75316420] }
  0x3b   : > { %v327_v38 = vsel %vm298_vm0, %v323_v36, 0.0  ;;  %v334_v39 = vsel %vm298_vm0, %v324_v37, 0.0  ;;  %347 = vst [vmem:[#allocation1] ss:$2 sm:$0xff] %v284_v0  ;;  %v360_v0 = vld [vmem:[%s623_s23] sm:$0xf] }
  0x3c   : > { %v328_v40 = vrot.slane %v327_v38, 4  ;;  %v335_v41 = vrot.slane %v334_v39, 4 }
  0x3e   : > { %v329_v42 = vadd.f32 %v328_v40, %v327_v38  ;;  %v336_v43 = vadd.f32 %v335_v41, %v334_v39 }
  0x40   : > { %v330_v44 = vrot.slane %v329_v42, 2  ;;  %v337_v45 = vrot.slane %v336_v43, 2 }
  0x42   : > { %v331_v46 = vadd.f32 %v330_v44, %v329_v42  ;;  %v338_v47 = vadd.f32 %v337_v45, %v336_v43  ;;  %v348_v56 = vld.sshfl [vmem:[#allocation1] sm:$0xff pattern:$0x75316420]  ;;  %v349_v58 = vld.sshfl [vmem:[#allocation1 + $0x8] sm:$0xff pattern:$0x75316420] }
  0x44   : > { %v332_v48 = vrot.slane %v331_v46, 1  ;;  %v339_v49 = vrot.slane %v338_v47, 1 }
  0x46   : > { %v333_v50 = vadd.f32 %v332_v48, %v331_v46  ;;  %v340_v51 = vadd.f32 %v339_v49, %v338_v47 }
  0x48   : > { %543 = vlog2.f32 %v333_v50 }
  0x49   : > { %545 = vlog2.f32 %v340_v51 }
  0x4e   : > { %v544_v52 = vpop.eup %543 }
  0x4f   : > { %v546_v53 = vpop.eup %545  ;;  %v342_v54 = vmul.f32 0.6931472, %v544_v52 }
  0x50   : > { %v344_v55 = vmul.f32 0.6931472, %v546_v53 }
  0x51   : > { %v345_v57 = vadd.f32 %v342_v54, %v305_v16 }
  0x52   : > { %v346_v59 = vadd.f32 %v344_v55, %v312_v15 }
  0x53   : > { %v352_v60 = vsub.f32 %v345_v57, %v348_v56 }
  0x54   : > { %v353_v61 = vsub.f32 %v346_v59, %v349_v58 }
  0x55   : > { %v354_v62 = vsel %vm637_vm1, %v352_v60, 0.0 }
  0x56   : > { %v355_v63 = vsel %vm641_vm2, %v353_v61, 0.0 }
  0x57   : > { %v358_v1 = vadd.f32 %v355_v63, %v354_v62 }
  0x59   : > { %v361_v2 = vadd.f32 %v360_v0, %v358_v1 }
  0x5b   : > { %362 = vst [vmem:[%s623_s23] sm:$0xf] %v361_v2 }
  0x5c PF: > { %s14_s14 = sadd.s32 1, %s569_s14   ;;  %s676_s12 = smov %s565_s13 }
  0x5d   : > { %p11_p5 = scmp.ge.s32.totalorder %s14_s14, 4   ;;  %s677_s13 = smov %s679_s15 }
  0x5f   :  { %13 = sbr.rel (!%p11_p5) target bundleno = 2 (0x2), region = 77 }

</bundles_post_ra>
